<compile_context>
chip_gen: v7x
topology: tpu7x:2x2x1
jax: 0.10.0
libtpu: 0.0.40
codegen_flags: <defaults>
</compile_context>

<pallas_src>
from typing import NamedTuple

import jax
import jax.numpy as jnp
from jax.experimental import pallas as pl
from jax.experimental.pallas import tpu as pltpu


def _round_up(x: int, m: int) -> int:
    return ((x + m - 1) // m) * m


def _round_down(x: int, m: int) -> int:
    return (x // m) * m


def _vmem_budget_bytes() -> int:
    """Usable VMEM budget with ~25% headroom left for Mosaic internal scratch."""
    try:
        cap = int(pltpu.get_tpu_info().vmem_capacity_bytes)
    except Exception:  # pragma: no cover - be conservative (v7x per-TC VMEM)
        cap = 64 * 1024 * 1024
    return (cap * 3) // 4


class ClassifierParams(NamedTuple):
    w1: jax.Array        # (D, Hp)   hidden dim lane-padded to a multiple of 128
    b1: jax.Array        # (1, Hp)
    w2: jax.Array        # (Hp, Tp)  hidden / target dims lane-padded
    b2: jax.Array        # (1, Tp)
    target_size: int     # un-padded T (used to slice the padded output)


def pad_classifier_params(w1, b1, w2, b2, dtype=None) -> ClassifierParams:
    """Pad the Linear parameters ONCE at init time (not per forward call).

    w1: (D, H), b1: (H,), w2: (H, T), b2: (T,).  Only H / T (lane) dims are
    zero-padded; zero pads are exact (ReLU(0)=0, zero bias, padded T sliced off).
    Pass dtype=jnp.bfloat16 to store weights bf16 for bf16-native MXU matmuls.
    """
    D, H = w1.shape
    T = w2.shape[1]
    Hp = _round_up(H, 128)
    Tp = _round_up(T, 128)
    if dtype is not None:
        w1, b1, w2, b2 = (a.astype(dtype) for a in (w1, b1, w2, b2))
    w1_p = jnp.zeros((D, Hp), w1.dtype).at[:, :H].set(w1)
    b1_p = jnp.zeros((1, Hp), b1.dtype).at[0, :H].set(b1)
    w2_p = jnp.zeros((Hp, Tp), w2.dtype).at[:H, :T].set(w2)
    b2_p = jnp.zeros((1, Tp), b2.dtype).at[0, :T].set(b2)
    return ClassifierParams(w1_p, b1_p, w2_p, b2_p, T)


# ----------------------------------------------------------------------------
# Kernels
# ----------------------------------------------------------------------------
def _classifier_resident_kernel(x_ref, w1_ref, b1_ref, w2_ref, b2_ref, o_ref):
    # x: (TB, D)   w1: (D, Hp)   b1: (1, Hp)   w2: (Hp, Tp)   b2: (1, Tp)
    x = x_ref[...].astype(w1_ref.dtype)
    h = jnp.dot(x, w1_ref[...], preferred_element_type=jnp.float32)
    h = jnp.maximum(h + b1_ref[...].astype(jnp.float32), 0.0)
    logits = jnp.dot(h.astype(w2_ref.dtype), w2_ref[...],
                     preferred_element_type=jnp.float32)
    o_ref[...] = (logits + b2_ref[...].astype(jnp.float32)).astype(o_ref.dtype)


def _classifier_blocked_kernel(x_ref, w1_ref, b1_ref, w2_ref, b2_ref, o_ref, acc_ref):
    # grid = (batch, T-tiles, H-tiles); reduction over H (last axis, "arbitrary").
    k = pl.program_id(2)

    @pl.when(k == 0)
    def _init():
        acc_ref[...] = jnp.zeros_like(acc_ref)

    x = x_ref[...].astype(w1_ref.dtype)
    h = jnp.dot(x, w1_ref[...], preferred_element_type=jnp.float32)
    h = jnp.maximum(h + b1_ref[...].astype(jnp.float32), 0.0)
    acc_ref[...] += jnp.dot(h.astype(w2_ref.dtype), w2_ref[...],
                            preferred_element_type=jnp.float32)

    @pl.when(k == pl.num_programs(2) - 1)
    def _finalize():
        o_ref[...] = (acc_ref[...] + b2_ref[...].astype(jnp.float32)).astype(o_ref.dtype)


# ----------------------------------------------------------------------------
# Forward wrapper
# ----------------------------------------------------------------------------
def classifier_forward(x, params: ClassifierParams, *, batch_tile=None,
                       mode="auto", force_pallas=False):
    """x: (B, D) activations; params: pre-padded ClassifierParams. Returns (B, T)."""
    if mode not in ("auto", "resident", "blocked"):
        raise ValueError(f"unknown mode: {mode}")

    B, D = x.shape
    Hp = params.w1.shape[1]
    Tp = params.w2.shape[1]
    T = params.target_size
    out_dtype = x.dtype

    # Tiny problems (e.g. B=8, D=32, H=64, T=16): a single padded 8x128 matmul uses
    # <1% of any generation's MXU and call overhead dominates -> let XLA fuse it.
    if mode == "auto" and not force_pallas and B * (D + Tp) * Hp <= (1 << 21):
        h = jnp.maximum(jnp.dot(x, params.w1) + params.b1, 0.0)
        logits = jnp.dot(h, params.w2) + params.b2
        return logits[:, :T].astype(out_dtype)

    x_item = x.dtype.itemsize
    w_item = params.w1.dtype.itemsize
    o_item = jnp.dtype(out_dtype).itemsize
    budget = _vmem_budget_bytes()

    # Advisory cost hint: padded shapes, true itemsizes, output included.
    cost = pl.CostEstimate(
        flops=2 * B * (D * Hp + Hp * Tp),
        transcendentals=0,
        bytes_accessed=(B * D * x_item
                        + (D * Hp + Hp + Hp * Tp + Tp) * w_item
                        + B * Tp * o_item),
    )

    resident_wgt = (D * Hp + Hp * Tp + Hp + Tp) * w_item           # single-buffered
    per_row_res = 2 * (D * x_item + Tp * o_item) + Hp * 4          # dbl-buf act + f32 h
    use_resident = (mode == "resident") or (
        mode == "auto" and resident_wgt + 8 * per_row_res + (2 << 20) <= budget)

    if use_resident:
        # ------------------- VMEM-resident weights, batch-blocked grid --------------
        if batch_tile is None:
            tb_cap = max(8, _round_down(
                max(budget - resident_wgt - (2 << 20), 8 * per_row_res) // per_row_res, 8))
            TB = max(8, min(1024, _round_up(B, 8), tb_cap))
            # Keep >=2 batch tiles when possible so v7x's two TensorCores both get work.
            while TB > 8 and pl.cdiv(B, TB) < 2:
                TB = max(8, _round_up(TB // 2, 8))
        else:
            TB = max(8, _round_up(min(batch_tile, _round_up(B, 8)), 8))
        n_b = pl.cdiv(B, TB)

        def _resident_call(single_buffer_weights: bool):
            wbuf = 1 if single_buffer_weights else 2
            vmem_limit = int(min(budget, max(4 << 20,
                (wbuf * resident_wgt + TB * per_row_res) * 5 // 4)))
            wkw = dict(pipeline_mode=pl.Buffered(1)) if single_buffer_weights else {}
            in_specs = [
                pl.BlockSpec((TB, D), lambda i: (i, 0)),            # x: blocked batch
                pl.BlockSpec((D, Hp), lambda i: (0, 0), **wkw),     # w1: resident
                pl.BlockSpec((1, Hp), lambda i: (0, 0), **wkw),     # b1
                pl.BlockSpec((Hp, Tp), lambda i: (0, 0), **wkw),    # w2
                pl.BlockSpec((1, Tp), lambda i: (0, 0), **wkw),     # b2
            ]
            return pl.pallas_call(
                _classifier_resident_kernel,
                out_shape=jax.ShapeDtypeStruct((B, Tp), out_dtype),
                grid_spec=pltpu.PrefetchScalarGridSpec(
                    num_scalar_prefetch=0,
                    grid=(n_b,),
                    in_specs=in_specs,
                    out_specs=pl.BlockSpec((TB, Tp), lambda i: (i, 0)),
                ),
                compiler_params=pltpu.CompilerParams(
                    dimension_semantics=("parallel",),
                    vmem_limit_bytes=vmem_limit,
                ),
                cost_estimate=cost,
            )(x, params.w1, params.b1, params.w2, params.b2)

        try:
            out_p = _resident_call(True)     # single-buffered resident weights
        except Exception:
            out_p = _resident_call(False)    # fallback: default double buffering
        return out_p[:, :T]

    # ------------------- H/T-blocked fallback (weights too large for VMEM) ---------
    tk = next(t for t in (512, 256, 128) if Hp % t == 0)
    tn = next(t for t in (512, 256, 128) if Tp % t == 0)
    # TODO(synk): also block the D (embed) contraction if a (D, tk) w1 slab is itself
    # too large for VMEM (very large embed_dim).

    blk_wgt = 2 * (D * tk + tk * tn + tk + tn) * w_item            # double-buffered blocks
    per_row = 2 * (D * x_item + tn * o_item) + (tk + tn) * 4       # act blocks + f32 h/acc

    if batch_tile is None:
        tb_cap = max(8, _round_down(
            max(budget - blk_wgt - (2 << 20), 8 * per_row) // per_row, 8))
        TB = max(8, min(512, _round_up(B, 8), tb_cap))
        while TB > 8 and pl.cdiv(B, TB) < 2:
            TB = max(8, _round_up(TB // 2, 8))
    else:
        TB = max(8, _round_up(min(batch_tile, _round_up(B, 8)), 8))

    n_b, n_t, n_k = pl.cdiv(B, TB), Tp // tn, Hp // tk
    vmem_limit = int(min(budget, max(4 << 20, (blk_wgt + TB * per_row) * 5 // 4)))

    out_p = pl.pallas_call(
        _classifier_blocked_kernel,
        out_shape=jax.ShapeDtypeStruct((B, Tp), out_dtype),
        grid_spec=pltpu.PrefetchScalarGridSpec(
            num_scalar_prefetch=0,
            grid=(n_b, n_t, n_k),
            in_specs=[
                pl.BlockSpec((TB, D), lambda i, j, k: (i, 0)),
                pl.BlockSpec((D, tk), lambda i, j, k: (0, k)),
                pl.BlockSpec((1, tk), lambda i, j, k: (0, k)),
                pl.BlockSpec((tk, tn), lambda i, j, k: (k, j)),
                pl.BlockSpec((1, tn), lambda i, j, k: (0, j)),
            ],
            out_specs=pl.BlockSpec((TB, tn), lambda i, j, k: (i, j)),
            scratch_shapes=[pltpu.VMEM((TB, tn), jnp.float32)],
        ),
        compiler_params=pltpu.CompilerParams(
            dimension_semantics=("parallel", "parallel", "arbitrary"),
            vmem_limit_bytes=vmem_limit,
        ),
        cost_estimate=cost,
    )(x, params.w1, params.b1, params.w2, params.b2)
    return out_p[:, :T]


# ----------------------------------------------------------------------------
# Self test
# ----------------------------------------------------------------------------
if __name__ == "__main__":
    key = jax.random.PRNGKey(0)
    kx, kw1, kb1, kw2, kb2, kx2, kx3 = jax.random.split(key, 7)

    # Shapes implied by the module.
    batch, embed_dim, hidden_dim, target_size = 8, 32, 64, 16
    x = jax.random.normal(kx, (batch, embed_dim), dtype=jnp.float32)
    w1 = jax.random.normal(kw1, (embed_dim, hidden_dim), dtype=jnp.float32) * 0.1
    b1 = jax.random.normal(kb1, (hidden_dim,), dtype=jnp.float32) * 0.1
    w2 = jax.random.normal(kw2, (hidden_dim, target_size), dtype=jnp.float32) * 0.1
    b2 = jax.random.normal(kb2, (target_size,), dtype=jnp.float32) * 0.1

    params = pad_classifier_params(w1, b1, w2, b2)   # padded ONCE, at "init"

    def reference(xx, a, c, bd, e):
        return jnp.maximum(xx @ a + c, 0.0) @ bd + e

    # 1) Tiny module shapes, Pallas resident-weight path forced.
    out = jax.block_until_ready(classifier_forward(x, params, force_pallas=True))
    assert out.shape == (batch, target_size)
    assert jnp.allclose(out, reference(x, w1, b1, w2, b2), atol=1e-5, rtol=1e-5)

    # 2) Multi-tile batch grid with a ragged last tile (no batch padding copies).
    x2 = jax.random.normal(kx2, (50, embed_dim), dtype=jnp.float32)
    out2 = jax.block_until_ready(
        classifier_forward(x2, params, batch_tile=16, force_pallas=True))
    assert out2.shape == (50, target_size)
    assert jnp.allclose(out2, reference(x2, w1, b1, w2, b2), atol=1e-5, rtol=1e-5)

    # 3) H/T-blocked fallback path (forced) -> exercises the reduction grid + acc scratch.
    B3, D3, H3, T3 = 48, 40, 384, 160
    ks = jax.random.split(kx3, 5)
    x3 = jax.random.normal(ks[0], (B3, D3), dtype=jnp.float32)
    w1b = jax.random.normal(ks[1], (D3, H3), dtype=jnp.float32) * 0.05
    b1b = jax.random.normal(ks[2], (H3,), dtype=jnp.float32) * 0.05
    w2b = jax.random.normal(ks[3], (H3, T3), dtype=jnp.float32) * 0.05
    b2b = jax.random.normal(ks[4], (T3,), dtype=jnp.float32) * 0.05
    params3 = pad_classifier_params(w1b, b1b, w2b, b2b)
    out3 = jax.block_until_ready(
        classifier_forward(x3, params3, batch_tile=16, mode="blocked"))
    assert out3.shape == (B3, T3)
    assert jnp.allclose(out3, reference(x3, w1b, b1b, w2b, b2b), atol=1e-4, rtol=1e-4)

    # 4) Default auto-dispatch for the tiny shapes (fused XLA path).
    out4 = jax.block_until_ready(classifier_forward(x, params))
    assert jnp.allclose(out4, reference(x, w1, b1, w2, b2), atol=1e-5, rtol=1e-5)

    print("KERNEL_OK")
</pallas_src>

<mosaic_0001>
module attributes {stable_mosaic.version = 11 : i64} {
  func.func @_classifier_resident_kernel(%arg0: i32, %arg1: memref<8x32xf32, #tpu.memory_space<vmem>>, %arg2: memref<32x128xf32, #tpu.memory_space<vmem>>, %arg3: memref<1x128xf32, #tpu.memory_space<vmem>>, %arg4: memref<128x128xf32, #tpu.memory_space<vmem>>, %arg5: memref<1x128xf32, #tpu.memory_space<vmem>>, %arg6: memref<8x128xf32, #tpu.memory_space<vmem>>) attributes {dimension_semantics = [#tpu.dimension_semantics<parallel>], iteration_bounds = array<i64: 1>, scalar_prefetch = 0 : i64, scratch_operands = 0 : i64, tpu.core_type = #tpu.core_type<tc>, window_params = [{transform_indices = @transform_0, window_bounds = array<i64: 8, 32>}, {pipeline_mode = #tpu.pipeline_mode<synchronous>, transform_indices = @transform_1, window_bounds = array<i64: 32, 128>}, {pipeline_mode = #tpu.pipeline_mode<synchronous>, transform_indices = @transform_2, window_bounds = array<i64: 1, 128>}, {pipeline_mode = #tpu.pipeline_mode<synchronous>, transform_indices = @transform_3, window_bounds = array<i64: 128, 128>}, {pipeline_mode = #tpu.pipeline_mode<synchronous>, transform_indices = @transform_4, window_bounds = array<i64: 1, 128>}, {transform_indices = @transform_5, window_bounds = array<i64: 8, 128>}]} {
    %c0 = arith.constant 0 : index
    %c0_0 = arith.constant 0 : index
    %0 = vector.load %arg1[%c0, %c0_0] : memref<8x32xf32, #tpu.memory_space<vmem>>, vector<8x32xf32>
    %c0_1 = arith.constant 0 : index
    %c0_2 = arith.constant 0 : index
    %1 = vector.load %arg2[%c0_1, %c0_2] : memref<32x128xf32, #tpu.memory_space<vmem>>, vector<32x128xf32>
    %cst = arith.constant dense<0.000000e+00> : vector<8x128xf32>
    %2 = tpu.matmul %0, %1, %cst {dimension_numbers = #tpu.dot_dimension_numbers<[1], [0], [0], [1], [0, 0, 1, 1], [], []>} : vector<8x32xf32>, vector<32x128xf32>, vector<8x128xf32> -> vector<8x128xf32>
    %c0_3 = arith.constant 0 : index
    %c0_4 = arith.constant 0 : index
    %3 = vector.load %arg3[%c0_3, %c0_4] : memref<1x128xf32, #tpu.memory_space<vmem>>, vector<1x128xf32>
    %4 = vector.broadcast %3 : vector<1x128xf32> to vector<8x128xf32>
    %5 = arith.addf %2, %4 : vector<8x128xf32>
    %cst_5 = arith.constant 0.000000e+00 : f32
    %6 = vector.broadcast %cst_5 : f32 to vector<8x128xf32>
    %7 = arith.maximumf %5, %6 : vector<8x128xf32>
    %c0_6 = arith.constant 0 : index
    %c0_7 = arith.constant 0 : index
    %8 = vector.load %arg4[%c0_6, %c0_7] : memref<128x128xf32, #tpu.memory_space<vmem>>, vector<128x128xf32>
    %cst_8 = arith.constant dense<0.000000e+00> : vector<8x128xf32>
    %9 = tpu.matmul %7, %8, %cst_8 {dimension_numbers = #tpu.dot_dimension_numbers<[1], [0], [0], [1], [0, 0, 1, 1], [], []>} : vector<8x128xf32>, vector<128x128xf32>, vector<8x128xf32> -> vector<8x128xf32>
    %c0_9 = arith.constant 0 : index
    %c0_10 = arith.constant 0 : index
    %10 = vector.load %arg5[%c0_9, %c0_10] : memref<1x128xf32, #tpu.memory_space<vmem>>, vector<1x128xf32>
    %11 = vector.broadcast %10 : vector<1x128xf32> to vector<8x128xf32>
    %12 = arith.addf %9, %11 : vector<8x128xf32>
    %c0_11 = arith.constant 0 : index
    %c0_12 = arith.constant 0 : index
    %13 = vector.load %arg6[%c0_11, %c0_12] : memref<8x128xf32, #tpu.memory_space<vmem>>, vector<8x128xf32>
    tpu.vector_store %arg6[%c0_11, %c0_12], %12 {strides = array<i32>} : memref<8x128xf32, #tpu.memory_space<vmem>>, vector<8x128xf32>,
    return
  }
  func.func @transform_0(%arg0: i32) -> (i32, i32) {
    %c0_i32 = arith.constant 0 : i32
    %c0_i32_0 = arith.constant 0 : i32
    return %arg0, %c0_i32 : i32, i32
  }
  func.func @transform_1(%arg0: i32) -> (i32, i32) {
    %c0_i32 = arith.constant 0 : i32
    %c0_i32_0 = arith.constant 0 : i32
    %c0_i32_1 = arith.constant 0 : i32
    return %c0_i32, %c0_i32_0 : i32, i32
  }
  func.func @transform_2(%arg0: i32) -> (i32, i32) {
    %c0_i32 = arith.constant 0 : i32
    %c0_i32_0 = arith.constant 0 : i32
    %c0_i32_1 = arith.constant 0 : i32
    return %c0_i32, %c0_i32_0 : i32, i32
  }
  func.func @transform_3(%arg0: i32) -> (i32, i32) {
    %c0_i32 = arith.constant 0 : i32
    %c0_i32_0 = arith.constant 0 : i32
    %c0_i32_1 = arith.constant 0 : i32
    return %c0_i32, %c0_i32_0 : i32, i32
  }
  func.func @transform_4(%arg0: i32) -> (i32, i32) {
    %c0_i32 = arith.constant 0 : i32
    %c0_i32_0 = arith.constant 0 : i32
    %c0_i32_1 = arith.constant 0 : i32
    return %c0_i32, %c0_i32_0 : i32, i32
  }
  func.func @transform_5(%arg0: i32) -> (i32, i32) {
    %c0_i32 = arith.constant 0 : i32
    %c0_i32_0 = arith.constant 0 : i32
    return %arg0, %c0_i32 : i32, i32
  }
}

module attributes {stable_mosaic.version = 11 : i64} {
  func.func @_classifier_resident_kernel(%arg0: i32, %arg1: memref<8x32xf32, #tpu.memory_space<vmem>>, %arg2: memref<32x128xf32, #tpu.memory_space<vmem>>, %arg3: memref<1x128xf32, #tpu.memory_space<vmem>>, %arg4: memref<128x128xf32, #tpu.memory_space<vmem>>, %arg5: memref<1x128xf32, #tpu.memory_space<vmem>>, %arg6: memref<8x128xf32, #tpu.memory_space<vmem>>) attributes {dimension_semantics = [#tpu.dimension_semantics<parallel>], iteration_bounds = array<i64: 1>, scalar_prefetch = 0 : i64, scratch_operands = 0 : i64, tpu.core_type = #tpu.core_type<tc>, window_params = [{transform_indices = @transform_0, window_bounds = array<i64: 8, 32>}, {pipeline_mode = #tpu.pipeline_mode<synchronous>, transform_indices = @transform_1, window_bounds = array<i64: 32, 128>}, {pipeline_mode = #tpu.pipeline_mode<synchronous>, transform_indices = @transform_2, window_bounds = array<i64: 1, 128>}, {pipeline_mode = #tpu.pipeline_mode<synchronous>, transform_indices = @transform_3, window_bounds = array<i64: 128, 128>}, {pipeline_mode = #tpu.pipeline_mode<synchronous>, transform_indices = @transform_4, window_bounds = array<i64: 1, 128>}, {transform_indices = @transform_5, window_bounds = array<i64: 8, 128>}]} {
    %c0 = arith.constant 0 : index
    %c0_0 = arith.constant 0 : index
    %0 = vector.load %arg1[%c0, %c0_0] : memref<8x32xf32, #tpu.memory_space<vmem>>, vector<8x32xf32>
    %c0_1 = arith.constant 0 : index
    %c0_2 = arith.constant 0 : index
    %1 = vector.load %arg2[%c0_1, %c0_2] : memref<32x128xf32, #tpu.memory_space<vmem>>, vector<32x128xf32>
    %cst = arith.constant dense<0.000000e+00> : vector<8x128xf32>
    %2 = tpu.matmul %0, %1, %cst {dimension_numbers = #tpu.dot_dimension_numbers<[1], [0], [0], [1], [0, 0, 1, 1], [], []>} : vector<8x32xf32>, vector<32x128xf32>, vector<8x128xf32> -> vector<8x128xf32>
    %c0_3 = arith.constant 0 : index
    %c0_4 = arith.constant 0 : index
    %3 = vector.load %arg3[%c0_3, %c0_4] : memref<1x128xf32, #tpu.memory_space<vmem>>, vector<1x128xf32>
    %4 = vector.broadcast %3 : vector<1x128xf32> to vector<8x128xf32>
    %5 = arith.addf %2, %4 : vector<8x128xf32>
    %cst_5 = arith.constant 0.000000e+00 : f32
    %6 = vector.broadcast %cst_5 : f32 to vector<8x128xf32>
    %7 = arith.maximumf %5, %6 : vector<8x128xf32>
    %c0_6 = arith.constant 0 : index
    %c0_7 = arith.constant 0 : index
    %8 = vector.load %arg4[%c0_6, %c0_7] : memref<128x128xf32, #tpu.memory_space<vmem>>, vector<128x128xf32>
    %cst_8 = arith.constant dense<0.000000e+00> : vector<8x128xf32>
    %9 = tpu.matmul %7, %8, %cst_8 {dimension_numbers = #tpu.dot_dimension_numbers<[1], [0], [0], [1], [0, 0, 1, 1], [], []>} : vector<8x128xf32>, vector<128x128xf32>, vector<8x128xf32> -> vector<8x128xf32>
    %c0_9 = arith.constant 0 : index
    %c0_10 = arith.constant 0 : index
    %10 = vector.load %arg5[%c0_9, %c0_10] : memref<1x128xf32, #tpu.memory_space<vmem>>, vector<1x128xf32>
    %11 = vector.broadcast %10 : vector<1x128xf32> to vector<8x128xf32>
    %12 = arith.addf %9, %11 : vector<8x128xf32>
    %c0_11 = arith.constant 0 : index
    %c0_12 = arith.constant 0 : index
    %13 = vector.load %arg6[%c0_11, %c0_12] : memref<8x128xf32, #tpu.memory_space<vmem>>, vector<8x128xf32>
    tpu.vector_store %arg6[%c0_11, %c0_12], %12 {strides = array<i32>} : memref<8x128xf32, #tpu.memory_space<vmem>>, vector<8x128xf32>,
    return
  }
  func.func @transform_0(%arg0: i32) -> (i32, i32) {
    %c0_i32 = arith.constant 0 : i32
    %c0_i32_0 = arith.constant 0 : i32
    return %arg0, %c0_i32 : i32, i32
  }
  func.func @transform_1(%arg0: i32) -> (i32, i32) {
    %c0_i32 = arith.constant 0 : i32
    %c0_i32_0 = arith.constant 0 : i32
    %c0_i32_1 = arith.constant 0 : i32
    return %c0_i32, %c0_i32_0 : i32, i32
  }
  func.func @transform_2(%arg0: i32) -> (i32, i32) {
    %c0_i32 = arith.constant 0 : i32
    %c0_i32_0 = arith.constant 0 : i32
    %c0_i32_1 = arith.constant 0 : i32
    return %c0_i32, %c0_i32_0 : i32, i32
  }
  func.func @transform_3(%arg0: i32) -> (i32, i32) {
    %c0_i32 = arith.constant 0 : i32
    %c0_i32_0 = arith.constant 0 : i32
    %c0_i32_1 = arith.constant 0 : i32
    return %c0_i32, %c0_i32_0 : i32, i32
  }
  func.func @transform_4(%arg0: i32) -> (i32, i32) {
    %c0_i32 = arith.constant 0 : i32
    %c0_i32_0 = arith.constant 0 : i32
    %c0_i32_1 = arith.constant 0 : i32
    return %c0_i32, %c0_i32_0 : i32, i32
  }
  func.func @transform_5(%arg0: i32) -> (i32, i32) {
    %c0_i32 = arith.constant 0 : i32
    %c0_i32_0 = arith.constant 0 : i32
    return %arg0, %c0_i32 : i32, i32
  }
}

</mosaic_0001>

<bundles_post_ra>
// kernel: tpu_custom_call.1
= control target key start
LH: loop header
LB: loop body
LE: loop exit
PB: predicated region body
PF: predicated region fallthrough
CT: control target
= control target key end

     0   :  { %10 = vsyncpa [#allocation3], 0  ;;  %s560_s0 = inlined_call_operand.hbm [shape: f32[8,32], index: 0, kind: input, shape index: {}]   ;;  %s561_s1 = inlined_call_operand.hbm [shape: f32[32,128], index: 1, kind: input, shape index: {}]   ;;  %s562_s2 = inlined_call_operand.vmem [shape: f32[1,128], index: 2, kind: input, shape index: {}]   ;;  %s563_s3 = inlined_call_operand.hbm [shape: f32[128,128], index: 3, kind: input, shape index: {}]   ;;  %s564_s4 = inlined_call_operand.vmem [shape: f32[1,128], index: 4, kind: input, shape index: {}]   ;;  %s565_s5 = inlined_call_operand.hbm [shape: f32[8,128], index: 5, kind: output, shape index: {}]  }
   0x1   :  { %11 = vsyncpa [#allocation6], 0 }
   0x2   :  { %12 = vsyncpa [#allocation4], 0  ;;  %s461_s18 = smov [#allocation5]   ;;  %s367_s22 = scalar_lea.hbm %s561_s1, 512 }
   0x3   :  { %s28_s19 = sshll.u32 %s461_s18, 4  ;;  %p368_p0 = scmp.ne.s32.totalorder %s561_s1, %s367_s22  ;;  %s29_s19 = int_to_ptr.vmem [resolvable:$true] %s28_s19 }
   0x4   :  { %p371_p1 = scmp.lt.u32.totalorder %s367_s22, %s561_s1 }
   0x6   :  { %p373_p2 = pnand %p371_p1, %p368_p0 }
   0x8   :  { %376 = shalt.err (!%p373_p2)
}
   0x9   :  { %s377_s27 = scalar_lea.vmem %s29_s19, 512  ;;  %p382_p4 = scmp.lt.s32.totalorder %s29_s19, %s29_s19 }
   0xa   :  { %p378_p3 = scmp.ne.s32.totalorder %s29_s19, %s377_s27  ;;  %p383_p5 = scmp.lt.s32.totalorder %s377_s27, %s377_s27 }
   0xc   :  { %p384_p6 = por %p383_p5, %p382_p4 }
   0xe   :  { %p385_p7 = pnand %p384_p6, %p378_p3 }
  0x10   :  { %388 = shalt.err (!%p385_p7)
}
  0x11   :  { %s462_s28 = smov 128   ;;  %s463_s29 = smov 8  }
  0x12   :  { %34 = dma.hbm_to_vmem [thread:$0]  %s561_s1, 512, %s29_s19, [#allocation6], %s462_s28, %s462_s28, %s463_s29  }
  0x13   :  { %s464_s7 = smov [#allocation2]   ;;  %s465_s9 = smov [#allocation7]  }
  0x14   :  { %s19_s8 = sshll.u32 %s464_s7, 4  ;;  %s42_s10 = sshll.u32 %s465_s9, 4  ;;  %s20_s8 = int_to_ptr.vmem [resolvable:$true] %s19_s8  ;;  %s43_s10 = int_to_ptr.vmem [resolvable:$true] %s42_s10 }
  0x15   :  { %s389_s13 = scalar_lea.hbm %s560_s0, 128 }
  0x16   :  { %p390_p8 = scmp.ne.s32.totalorder %s560_s0, %s389_s13  ;;  %p393_p9 = scmp.lt.u32.totalorder %s389_s13, %s560_s0 }
  0x18   :  { %p395_p10 = pnand %p393_p9, %p390_p8 }
  0x1a   :  { %398 = shalt.err (!%p395_p10)
}
  0x1b   :  { %s399_s1 = scalar_lea.vmem %s20_s8, 128  ;;  %p404_p12 = scmp.lt.s32.totalorder %s20_s8, %s20_s8 }
  0x1c   :  { %p400_p11 = scmp.ne.s32.totalorder %s20_s8, %s399_s1  ;;  %p405_p13 = scmp.lt.s32.totalorder %s399_s1, %s399_s1 }
  0x1e   :  { %p406_p0 = por %p405_p13, %p404_p12 }
  0x20   :  { %p407_p1 = pnand %p406_p0, %p400_p11 }
  0x22   :  { %410 = shalt.err (!%p407_p1)
}
  0x23   :  { %22 = dma.hbm_to_vmem [thread:$0]  %s560_s0, 128, %s20_s8, [#allocation3]  }
  0x24   :  { %s411_s22 = scalar_lea.hbm %s563_s3, 2048 }
  0x25   :  { %p412_p2 = scmp.ne.s32.totalorder %s563_s3, %s411_s22  ;;  %p415_p3 = scmp.lt.u32.totalorder %s411_s22, %s563_s3 }
  0x27   :  { %p417_p4 = pnand %p415_p3, %p412_p2 }
  0x29   :  { %420 = shalt.err (!%p417_p4)
}
  0x2a   :  { %s421_s27 = scalar_lea.vmem %s43_s10, 2048  ;;  %p426_p6 = scmp.lt.s32.totalorder %s43_s10, %s43_s10 }
  0x2b   :  { %p422_p5 = scmp.ne.s32.totalorder %s43_s10, %s421_s27  ;;  %p427_p7 = scmp.lt.s32.totalorder %s421_s27, %s421_s27 }
  0x2d   :  { %p428_p8 = por %p427_p7, %p426_p6 }
  0x2f   :  { %p429_p9 = pnand %p428_p8, %p422_p5 }
  0x31   :  { %432 = shalt.err (!%p429_p9)
}
  0x32   :  { %48 = dma.hbm_to_vmem [thread:$0]  %s563_s3, 2048, %s43_s10, [#allocation6], %s462_s28, %s462_s28, %s463_s29  }
  0x33   :  { %455 = dma.done.wait [#allocation3], 128  }
  0x34   :  { %456 = vsyncadd [#allocation3], 4294967168 }
  0x35   :  { %457 = dma.done.wait [#allocation6], 2560  }
  0x36   :  { %458 = vsyncadd [#allocation6], 4294964736  ;;  %v466_v0 = vmov 0.0|0.0   ;;  %vm467_vm0 = vmmov 0   ;;  %v468_v1 = vmov 0.0   ;;  %v61_v2 = vld [vmem:[#allocation5] sm:$0xff] }
  0x37   :  { %328 = vmatprep.subr.bf16.mxu0 %v466_v0  ;;  %290 = vmatprep.mubr.msk.f32.mxu0 %vm467_vm0, %v468_v1  ;;  %v62_v3 = vld [vmem:[#allocation5 + $0x8] sm:$0xff]  ;;  %v63_v4 = vld [vmem:[#allocation5 + $0x10] sm:$0xff]  ;;  %v64_v6 = vld [vmem:[#allocation5 + $0x18] sm:$0xff]  ;;  %vm72_vm1 = vcmask 261120   ;;  %s469_s7 = smov [#allocation8]  }
  0x38   :  { %334 = vmatprep.subr.bf16.mxu1 %v466_v0  ;;  %325 = vmatprep.mubr.msk.f32.mxu1 %vm467_vm0, %v468_v1  ;;  %v329_v5 = vpack.c.bf16 %v62_v3, %v61_v2  ;;  %v147_v7 = vld [vmem:[#allocation7] sm:$0xff]  ;;  %v148_v8 = vld [vmem:[#allocation7 + $0x8] sm:$0xff]  ;;  %v149_v9 = vld [vmem:[#allocation7 + $0x10] sm:$0xff]  ;;  %v332_v11 = vpack.c.bf16 %v64_v6, %v63_v4  ;;  %s247_s8 = sshll.u32 %s469_s7, 4  ;;  %s248_s8 = int_to_ptr.vmem [resolvable:$true] %s247_s8 }
  0x39   :  { %v150_v10 = vld [vmem:[#allocation7 + $0x18] sm:$0xff]  ;;  %v335_v12 = vpack.c.bf16 %v148_v8, %v147_v7  ;;  %v151_v14 = vld [vmem:[#allocation7 + $0x20] sm:$0xff]  ;;  %v152_v15 = vld [vmem:[#allocation7 + $0x28] sm:$0xff]  ;;  %s433_s9 = scalar_lea.vmem %s248_s8, 128  ;;  %p438_p11 = scmp.lt.s32.totalorder %s248_s8, %s248_s8 }
  0x3a   :  { %330 = vmatpush3.bf16.msra.mxu0 %v329_v5  ;;  %v338_v13 = vpack.c.bf16 %v150_v10, %v149_v9  ;;  %v60_v16 = vld [vmem:[#allocation2] sm:$0xff]  ;;  %v341_v17 = vpack.c.bf16 %v152_v15, %v151_v14  ;;  %v153_v18 = vld [vmem:[#allocation7 + $0x30] sm:$0xff]  ;;  %v155_v21 = vld [vmem:[#allocation7 + $0x40] sm:$0xff]  ;;  %p434_p10 = scmp.ne.s32.totalorder %s248_s8, %s433_s9  ;;  %p439_p12 = scmp.lt.s32.totalorder %s433_s9, %s433_s9 }
  0x3b   :  { %331 = vmatprep.subr.bf16.mxu0 %v466_v0  ;;  %336 = vmatpush3.bf16.msra.mxu1 %v335_v12  ;;  %v154_v19 = vld [vmem:[#allocation7 + $0x38] sm:$0xff]  ;;  %v156_v22 = vld [vmem:[#allocation7 + $0x48] sm:$0xff]  ;;  %v157_v24 = vld [vmem:[#allocation7 + $0x50] sm:$0xff] }
  0x3c   :  { %337 = vmatprep.subr.bf16.mxu1 %v466_v0  ;;  %v344_v20 = vpack.c.bf16 %v154_v19, %v153_v18  ;;  %v347_v23 = vpack.c.bf16 %v156_v22, %v155_v21  ;;  %v158_v25 = vld [vmem:[#allocation7 + $0x58] sm:$0xff]  ;;  %v159_v27 = vld [vmem:[#allocation7 + $0x60] sm:$0xff]  ;;  %v160_v28 = vld [vmem:[#allocation7 + $0x68] sm:$0xff]  ;;  %p440_p13 = por %p439_p12, %p438_p11 }
  0x3d   :  { %v350_v26 = vpack.c.bf16 %v158_v25, %v157_v24  ;;  %v353_v29 = vpack.c.bf16 %v160_v28, %v159_v27  ;;  %v161_v30 = vld [vmem:[#allocation7 + $0x70] sm:$0xff]  ;;  %v162_v31 = vld [vmem:[#allocation7 + $0x78] sm:$0xff] }
  0x3e   :  { %333 = vmatpush3.bf16.msra.mxu0 %v332_v11  ;;  %v356_v32 = vpack.c.bf16 %v162_v31, %v161_v30  ;;  %v257_v33 = vld [vmem:[%s562_s2] ss:$0 sm:$0xff]  ;;  %p441_p0 = pnand %p440_p13, %p434_p10 }
  0x3f   :  { %339 = vmatpush3.bf16.msra.mxu1 %v338_v13  ;;  %v259_v38 = vld [vmem:[%s564_s4] ss:$0 sm:$0xff] }
  0x40   :  { %340 = vmatprep.subr.bf16.mxu1 %v466_v0 }
  0x41   :  { %291 = vmatmul.mubr.msk.f32.vlgmr.msra.gmra.mrb[0].mxu0 %vm72_vm1, %v60_v16 }
  0x43   :  { %342 = vmatpush3.bf16.msra.mxu1 %v341_v17 }
  0x44   :  { %343 = vmatprep.subr.bf16.mxu1 %v466_v0 }
  0x47   :  { %345 = vmatpush3.bf16.msra.mxu1 %v344_v20 }
  0x48   :  { %346 = vmatprep.subr.bf16.mxu1 %v466_v0 }
  0x4b   :  { %348 = vmatpush3.bf16.msra.mxu1 %v347_v23 }
  0x4c   :  { %349 = vmatprep.subr.bf16.mxu1 %v466_v0 }
  0x4f   :  { %351 = vmatpush3.bf16.msra.mxu1 %v350_v26 }
  0x50   :  { %352 = vmatprep.subr.bf16.mxu1 %v466_v0 }
  0x53   :  { %354 = vmatpush3.bf16.msra.mxu1 %v353_v29 }
  0x54   :  { %355 = vmatprep.subr.bf16.mxu1 %v466_v0 }
  0x57   :  { %357 = vmatpush3.bf16.msra.mxu1 %v356_v32 }
 0x114   :  { %v142_v34 = vpop.f32.mrb[0].mxu0 }
 0x115   :  { %v143_v35 = vadd.f32 %v257_v33, %v142_v34  ;;  %v292_v36 = vpop.f32.mrb[1].mxu0 }
 0x117   :  { %v146_v37 = vmax.f32 %v143_v35, 0.0 }
 0x119   :  { %326 = vmatmul.mubr.f32.vlgmr.msra.gmra.mrb[0].mxu1 %v146_v37 }
 0x1ec   :  { %v236_v39 = vpop.f32.mrb[0].mxu1 }
 0x1ed   :  { %v237_v40 = vadd.f32 %v259_v38, %v236_v39  ;;  %v327_v41 = vpop.f32.mrb[1].mxu1 }
 0x1ef   :  { %240 = vst [vmem:[#allocation8] sm:$0xff] %v237_v40 }
 0x1f0   :  { %444 = shalt.err (!%p441_p0)
}
 0x1f1   :  { %s445_s11 = scalar_lea.hbm %s565_s5, 128 }
 0x1f2   :  { %p446_p1 = scmp.ne.s32.totalorder %s565_s5, %s445_s11  ;;  %p449_p2 = scmp.lt.u32.totalorder %s445_s11, %s565_s5 }
 0x1f4   :  { %p451_p3 = pnand %p449_p2, %p446_p1 }
 0x1f6   :  { %454 = shalt.err (!%p451_p3)
}
 0x1f7   :  { %250 = dma.vmem_to_hbm [thread:$0]  %s248_s8, 128, %s565_s5, [#allocation4]  }
 0x1f8   :  { %459 = dma.done.wait [#allocation4], 128  }
 0x1f9   :  { %460 = vsyncadd [#allocation4], 4294967168 }
 0x1fa   :  { %254 = vsyncpa [#allocation3], 1 }
 0x1fb   :  { %255 = vsyncpa [#allocation6], 1 }
 0x1fc   :  { %256 = vsyncpa [#allocation4], 1 }

// kernel: tpu_custom_call.1
= control target key start
LH: loop header
LB: loop body
LE: loop exit
PB: predicated region body
PF: predicated region fallthrough
CT: control target
= control target key end

     0   :  { %10 = vsyncpa [#allocation3], 0  ;;  %s560_s0 = inlined_call_operand.hbm [shape: f32[8,32], index: 0, kind: input, shape index: {}]   ;;  %s561_s1 = inlined_call_operand.hbm [shape: f32[32,128], index: 1, kind: input, shape index: {}]   ;;  %s562_s2 = inlined_call_operand.vmem [shape: f32[1,128], index: 2, kind: input, shape index: {}]   ;;  %s563_s3 = inlined_call_operand.hbm [shape: f32[128,128], index: 3, kind: input, shape index: {}]   ;;  %s564_s4 = inlined_call_operand.vmem [shape: f32[1,128], index: 4, kind: input, shape index: {}]   ;;  %s565_s5 = inlined_call_operand.hbm [shape: f32[8,128], index: 5, kind: output, shape index: {}]  }
   0x1   :  { %11 = vsyncpa [#allocation6], 0 }
   0x2   :  { %12 = vsyncpa [#allocation4], 0  ;;  %s461_s18 = smov [#allocation5]   ;;  %s367_s22 = scalar_lea.hbm %s561_s1, 512 }
   0x3   :  { %s28_s19 = sshll.u32 %s461_s18, 4  ;;  %p368_p0 = scmp.ne.s32.totalorder %s561_s1, %s367_s22  ;;  %s29_s19 = int_to_ptr.vmem [resolvable:$true] %s28_s19 }
   0x4   :  { %p371_p1 = scmp.lt.u32.totalorder %s367_s22, %s561_s1 }
   0x6   :  { %p373_p2 = pnand %p371_p1, %p368_p0 }
   0x8   :  { %376 = shalt.err (!%p373_p2)
}
   0x9   :  { %s377_s27 = scalar_lea.vmem %s29_s19, 512  ;;  %p382_p4 = scmp.lt.s32.totalorder %s29_s19, %s29_s19 }
   0xa   :  { %p378_p3 = scmp.ne.s32.totalorder %s29_s19, %s377_s27  ;;  %p383_p5 = scmp.lt.s32.totalorder %s377_s27, %s377_s27 }
   0xc   :  { %p384_p6 = por %p383_p5, %p382_p4 }
   0xe   :  { %p385_p7 = pnand %p384_p6, %p378_p3 }
  0x10   :  { %388 = shalt.err (!%p385_p7)
}
  0x11   :  { %s462_s28 = smov 128   ;;  %s463_s29 = smov 8  }
  0x12   :  { %34 = dma.hbm_to_vmem [thread:$0]  %s561_s1, 512, %s29_s19, [#allocation6], %s462_s28, %s462_s28, %s463_s29  }
  0x13   :  { %s464_s7 = smov [#allocation2]   ;;  %s465_s9 = smov [#allocation7]  }
  0x14   :  { %s19_s8 = sshll.u32 %s464_s7, 4  ;;  %s42_s10 = sshll.u32 %s465_s9, 4  ;;  %s20_s8 = int_to_ptr.vmem [resolvable:$true] %s19_s8  ;;  %s43_s10 = int_to_ptr.vmem [resolvable:$true] %s42_s10 }
  0x15   :  { %s389_s13 = scalar_lea.hbm %s560_s0, 128 }
  0x16   :  { %p390_p8 = scmp.ne.s32.totalorder %s560_s0, %s389_s13  ;;  %p393_p9 = scmp.lt.u32.totalorder %s389_s13, %s560_s0 }
  0x18   :  { %p395_p10 = pnand %p393_p9, %p390_p8 }
  0x1a   :  { %398 = shalt.err (!%p395_p10)
}
  0x1b   :  { %s399_s1 = scalar_lea.vmem %s20_s8, 128  ;;  %p404_p12 = scmp.lt.s32.totalorder %s20_s8, %s20_s8 }
  0x1c   :  { %p400_p11 = scmp.ne.s32.totalorder %s20_s8, %s399_s1  ;;  %p405_p13 = scmp.lt.s32.totalorder %s399_s1, %s399_s1 }
  0x1e   :  { %p406_p0 = por %p405_p13, %p404_p12 }
  0x20   :  { %p407_p1 = pnand %p406_p0, %p400_p11 }
  0x22   :  { %410 = shalt.err (!%p407_p1)
}
  0x23   :  { %22 = dma.hbm_to_vmem [thread:$0]  %s560_s0, 128, %s20_s8, [#allocation3]  }
  0x24   :  { %s411_s22 = scalar_lea.hbm %s563_s3, 2048 }
  0x25   :  { %p412_p2 = scmp.ne.s32.totalorder %s563_s3, %s411_s22  ;;  %p415_p3 = scmp.lt.u32.totalorder %s411_s22, %s563_s3 }
  0x27   :  { %p417_p4 = pnand %p415_p3, %p412_p2 }
  0x29   :  { %420 = shalt.err (!%p417_p4)
}
  0x2a   :  { %s421_s27 = scalar_lea.vmem %s43_s10, 2048  ;;  %p426_p6 = scmp.lt.s32.totalorder %s43_s10, %s43_s10 }
  0x2b   :  { %p422_p5 = scmp.ne.s32.totalorder %s43_s10, %s421_s27  ;;  %p427_p7 = scmp.lt.s32.totalorder %s421_s27, %s421_s27 }
  0x2d   :  { %p428_p8 = por %p427_p7, %p426_p6 }
  0x2f   :  { %p429_p9 = pnand %p428_p8, %p422_p5 }
  0x31   :  { %432 = shalt.err (!%p429_p9)
}
  0x32   :  { %48 = dma.hbm_to_vmem [thread:$0]  %s563_s3, 2048, %s43_s10, [#allocation6], %s462_s28, %s462_s28, %s463_s29  }
  0x33   :  { %455 = dma.done.wait [#allocation3], 128  }
  0x34   :  { %456 = vsyncadd [#allocation3], 4294967168 }
  0x35   :  { %457 = dma.done.wait [#allocation6], 2560  }
  0x36   :  { %458 = vsyncadd [#allocation6], 4294964736  ;;  %v466_v0 = vmov 0.0|0.0   ;;  %vm467_vm0 = vmmov 0   ;;  %v468_v1 = vmov 0.0   ;;  %v61_v2 = vld [vmem:[#allocation5] sm:$0xff] }
  0x37   :  { %328 = vmatprep.subr.bf16.mxu0 %v466_v0  ;;  %290 = vmatprep.mubr.msk.f32.mxu0 %vm467_vm0, %v468_v1  ;;  %v62_v3 = vld [vmem:[#allocation5 + $0x8] sm:$0xff]  ;;  %v63_v4 = vld [vmem:[#allocation5 + $0x10] sm:$0xff]  ;;  %v64_v6 = vld [vmem:[#allocation5 + $0x18] sm:$0xff]  ;;  %vm72_vm1 = vcmask 261120   ;;  %s469_s7 = smov [#allocation8]  }
  0x38   :  { %334 = vmatprep.subr.bf16.mxu1 %v466_v0  ;;  %325 = vmatprep.mubr.msk.f32.mxu1 %vm467_vm0, %v468_v1  ;;  %v329_v5 = vpack.c.bf16 %v62_v3, %v61_v2  ;;  %v147_v7 = vld [vmem:[#allocation7] sm:$0xff]  ;;  %v148_v8 = vld [vmem:[#allocation7 + $0x8] sm:$0xff]  ;;  %v149_v9 = vld [vmem:[#allocation7 + $0x10] sm:$0xff]  ;;  %v332_v11 = vpack.c.bf16 %v64_v6, %v63_v4  ;;  %s247_s8 = sshll.u32 %s469_s7, 4  ;;  %s248_s8 = int_to_ptr.vmem [resolvable:$true] %s247_s8 }
  0x39   :  { %v150_v10 = vld [vmem:[#allocation7 + $0x18] sm:$0xff]  ;;  %v335_v12 = vpack.c.bf16 %v148_v8, %v147_v7  ;;  %v151_v14 = vld [vmem:[#allocation7 + $0x20] sm:$0xff]  ;;  %v152_v15 = vld [vmem:[#allocation7 + $0x28] sm:$0xff]  ;;  %s433_s9 = scalar_lea.vmem %s248_s8, 128  ;;  %p438_p11 = scmp.lt.s32.totalorder %s248_s8, %s248_s8 }
  0x3a   :  { %330 = vmatpush3.bf16.msra.mxu0 %v329_v5  ;;  %v338_v13 = vpack.c.bf16 %v150_v10, %v149_v9  ;;  %v60_v16 = vld [vmem:[#allocation2] sm:$0xff]  ;;  %v341_v17 = vpack.c.bf16 %v152_v15, %v151_v14  ;;  %v153_v18 = vld [vmem:[#allocation7 + $0x30] sm:$0xff]  ;;  %v155_v21 = vld [vmem:[#allocation7 + $0x40] sm:$0xff]  ;;  %p434_p10 = scmp.ne.s32.totalorder %s248_s8, %s433_s9  ;;  %p439_p12 = scmp.lt.s32.totalorder %s433_s9, %s433_s9 }
  0x3b   :  { %331 = vmatprep.subr.bf16.mxu0 %v466_v0  ;;  %336 = vmatpush3.bf16.msra.mxu1 %v335_v12  ;;  %v154_v19 = vld [vmem:[#allocation7 + $0x38] sm:$0xff]  ;;  %v156_v22 = vld [vmem:[#allocation7 + $0x48] sm:$0xff]  ;;  %v157_v24 = vld [vmem:[#allocation7 + $0x50] sm:$0xff] }
  0x3c   :  { %337 = vmatprep.subr.bf16.mxu1 %v466_v0  ;;  %v344_v20 = vpack.c.bf16 %v154_v19, %v153_v18  ;;  %v347_v23 = vpack.c.bf16 %v156_v22, %v155_v21  ;;  %v158_v25 = vld [vmem:[#allocation7 + $0x58] sm:$0xff]  ;;  %v159_v27 = vld [vmem:[#allocation7 + $0x60] sm:$0xff]  ;;  %v160_v28 = vld [vmem:[#allocation7 + $0x68] sm:$0xff]  ;;  %p440_p13 = por %p439_p12, %p438_p11 }
  0x3d   :  { %v350_v26 = vpack.c.bf16 %v158_v25, %v157_v24  ;;  %v353_v29 = vpack.c.bf16 %v160_v28, %v159_v27  ;;  %v161_v30 = vld [vmem:[#allocation7 + $0x70] sm:$0xff]  ;;  %v162_v31 = vld [vmem:[#allocation7 + $0x78] sm:$0xff] }
  0x3e   :  { %333 = vmatpush3.bf16.msra.mxu0 %v332_v11  ;;  %v356_v32 = vpack.c.bf16 %v162_v31, %v161_v30  ;;  %v257_v33 = vld [vmem:[%s562_s2] ss:$0 sm:$0xff]  ;;  %p441_p0 = pnand %p440_p13, %p434_p10 }
  0x3f   :  { %339 = vmatpush3.bf16.msra.mxu1 %v338_v13  ;;  %v259_v38 = vld [vmem:[%s564_s4] ss:$0 sm:$0xff] }
  0x40   :  { %340 = vmatprep.subr.bf16.mxu1 %v466_v0 }
  0x41   :  { %291 = vmatmul.mubr.msk.f32.vlgmr.msra.gmra.mrb[0].mxu0 %vm72_vm1, %v60_v16 }
  0x43   :  { %342 = vmatpush3.bf16.msra.mxu1 %v341_v17 }
  0x44   :  { %343 = vmatprep.subr.bf16.mxu1 %v466_v0 }
  0x47   :  { %345 = vmatpush3.bf16.msra.mxu1 %v344_v20 }
  0x48   :  { %346 = vmatprep.subr.bf16.mxu1 %v466_v0 }
  0x4b   :  { %348 = vmatpush3.bf16.msra.mxu1 %v347_v23 }
  0x4c   :  { %349 = vmatprep.subr.bf16.mxu1 %v466_v0 }
  0x4f   :  { %351 = vmatpush3.bf16.msra.mxu1 %v350_v26 }
  0x50   :  { %352 = vmatprep.subr.bf16.mxu1 %v466_v0 }
  0x53   :  { %354 = vmatpush3.bf16.msra.mxu1 %v353_v29 }
  0x54   :  { %355 = vmatprep.subr.bf16.mxu1 %v466_v0 }
  0x57   :  { %357 = vmatpush3.bf16.msra.mxu1 %v356_v32 }
 0x114   :  { %v142_v34 = vpop.f32.mrb[0].mxu0 }
 0x115   :  { %v143_v35 = vadd.f32 %v257_v33, %v142_v34  ;;  %v292_v36 = vpop.f32.mrb[1].mxu0 }
 0x117   :  { %v146_v37 = vmax.f32 %v143_v35, 0.0 }
 0x119   :  { %326 = vmatmul.mubr.f32.vlgmr.msra.gmra.mrb[0].mxu1 %v146_v37 }
 0x1ec   :  { %v236_v39 = vpop.f32.mrb[0].mxu1 }
 0x1ed   :  { %v237_v40 = vadd.f32 %v259_v38, %v236_v39  ;;  %v327_v41 = vpop.f32.mrb[1].mxu1 }
 0x1ef   :  { %240 = vst [vmem:[#allocation8] sm:$0xff] %v237_v40 }
 0x1f0   :  { %444 = shalt.err (!%p441_p0)
}
 0x1f1   :  { %s445_s11 = scalar_lea.hbm %s565_s5, 128 }
 0x1f2   :  { %p446_p1 = scmp.ne.s32.totalorder %s565_s5, %s445_s11  ;;  %p449_p2 = scmp.lt.u32.totalorder %s445_s11, %s565_s5 }
 0x1f4   :  { %p451_p3 = pnand %p449_p2, %p446_p1 }
 0x1f6   :  { %454 = shalt.err (!%p451_p3)
}
 0x1f7   :  { %250 = dma.vmem_to_hbm [thread:$0]  %s248_s8, 128, %s565_s5, [#allocation4]  }
 0x1f8   :  { %459 = dma.done.wait [#allocation4], 128  }
 0x1f9   :  { %460 = vsyncadd [#allocation4], 4294967168 }
 0x1fa   :  { %254 = vsyncpa [#allocation3], 1 }
 0x1fb   :  { %255 = vsyncpa [#allocation6], 1 }
 0x1fc   :  { %256 = vsyncpa [#allocation4], 1 }

</bundles_post_ra>
